<compile_context>
chip_gen: v6e
topology: v6e:2x2x1
jax: 0.10.0
libtpu: 0.0.40
codegen_flags: <defaults>
</compile_context>

<pallas_src>
import functools

import jax
import jax.numpy as jnp
from jax import lax
from jax.experimental import pallas as pl
from jax.experimental.pallas import tpu as pltpu

_MIB = 1024 * 1024


def _nll_partial_kernel(pred_ref, tgt_ref, out_ref, *, n_rows):
    """One grid step: partial (sum of picked log-probs, valid-row count).

    pred_ref: (TILE, L) f32/bf16 block (L = lane width; 128 in the packed path).
    tgt_ref : (TILE, G) i32 block; each entry is the lane index (within L) of
              that row's target, or -1 for ignored / padded rows.
    out_ref : (1, 1, 2) f32 block: [sum, count] partials for this tile.
    """
    i = pl.program_id(0)
    pred = pred_ref[...].astype(jnp.float32)      # f32 compute (v5e: no bf16 VPU)
    tgt = tgt_ref[...]                            # (TILE, G) i32
    tile, lanes = pred.shape
    g = tgt.shape[1]

    # Mask off rows of the (possibly ragged) last grid tile.
    row_ids = lax.broadcasted_iota(jnp.int32, (tile, 1), 0) + i * tile
    row_valid = row_ids < n_rows                  # (TILE, 1)

    # One-hot gather via lane iota + compare (no dynamic gather on TPU). The G
    # packed targets of a row live in disjoint C-wide lane groups, so at most one
    # lane matches per original row; -1 sentinels never match.
    lane_ids = lax.broadcasted_iota(jnp.int32, (tile, lanes), 1)
    mask = lane_ids == tgt[:, 0:1]
    for j in range(1, g):
        mask = mask | (lane_ids == tgt[:, j:j + 1])
    mask = mask & row_valid

    picked = jnp.where(mask, pred, 0.0)           # select, not multiply: NaN-safe
    total = jnp.sum(picked)
    count = jnp.sum(mask.astype(jnp.float32))

    # Fused (sum, count): a single small store per grid step.
    out_lane = lax.broadcasted_iota(jnp.int32, (1, 1, 2), 2)
    out_ref[...] = jnp.where(out_lane == 0, total, count)


def _vmem_limit_bytes():
    """Generation-aware scoped-VMEM limit (v5e/v6e: 128 MiB, v7x: 64 MiB physical)."""
    try:
        cap = int(getattr(pltpu.get_tpu_info(), "vmem_capacity_bytes", 128 * _MIB))
    except Exception:
        cap = 64 * _MIB                           # conservative (v7x-sized) fallback
    return max(32 * _MIB, min((cap * 3) // 4, 96 * _MIB))


def _auto_tile_rows(n_rows, lane_width, pred_itemsize, vmem_limit):
    """Row tile such that double-buffered (pred + target) blocks fit ~60% of VMEM."""
    pred_row = ((lane_width + 127) // 128) * 128 * pred_itemsize  # lanes pad to 128
    tgt_row = 128 * 4                                             # (TILE, G) i32 lane-pads to 128
    per_row = pred_row + tgt_row
    budget = (vmem_limit * 5) // 8
    tile = budget // (2 * per_row)                                # 2 = double buffering
    tile = max(8, min(int(tile), n_rows))
    if tile < n_rows:
        tile = max(8, (tile // 8) * 8)                            # sublane-aligned
    return tile


def nll_loss(pred, target, *, tile_rows=None):
    """pred: (N, C) f32/bf16 log-probs; target: (N,) int class ids -> scalar f32."""
    n, c = pred.shape
    tgt = jnp.asarray(target, dtype=jnp.int32).reshape(n)
    valid = (tgt >= 0) & (tgt < c)

    # Lane-dense packing when it is a free reshape (C divides 128, N % G == 0).
    g = 128 // c if (c <= 128 and 128 % c == 0) else 1
    if g > 16 or (n % g) != 0:
        g = 1

    if g > 1:
        rows = jnp.arange(n, dtype=jnp.int32)
        lane_idx = jnp.where(valid, (rows % g) * c + tgt, -1)
        pred_p = pred.reshape(n // g, g * c)      # (R, 128) — free row-major view
        tgt_p = lane_idx.reshape(n // g, g)       # (R, G)
    else:
        lane_idx = jnp.where(valid, tgt, -1)
        pred_p = pred                             # (N, C)
        tgt_p = lane_idx.reshape(n, 1)

    r, lane_width = pred_p.shape
    vmem_limit = _vmem_limit_bytes()
    if tile_rows is None:
        tile_rows = _auto_tile_rows(r, lane_width, pred_p.dtype.itemsize, vmem_limit)
    tile_rows = min(int(tile_rows), r)
    if tile_rows < r:
        tile_rows = max(8, (tile_rows // 8) * 8)

    grid_n = pl.cdiv(r, tile_rows)
    kernel = functools.partial(_nll_partial_kernel, n_rows=r)
    tgt_lanes = tgt_p.shape[1]

    partials = pl.pallas_call(
        kernel,
        out_shape=jax.ShapeDtypeStruct((grid_n, 1, 2), jnp.float32),
        grid_spec=pl.GridSpec(
            grid=(grid_n,),
            in_specs=[
                pl.BlockSpec((tile_rows, lane_width), lambda i: (i, 0)),
                pl.BlockSpec((tile_rows, tgt_lanes), lambda i: (i, 0)),
            ],
            out_specs=pl.BlockSpec((1, 1, 2), lambda i: (i, 0, 0)),
        ),
        compiler_params=pltpu.CompilerParams(
            # Independent row tiles -> shardable across v7x's 2 TensorCores;
            # plain sequential pipelining on v5e / v6e.
            dimension_semantics=("parallel",),
            vmem_limit_bytes=vmem_limit,
        ),
    )(pred_p, tgt_p)

    total = jnp.sum(partials[:, 0, 0])
    count = jnp.sum(partials[:, 0, 1])
    # count == 0 (all targets ignored) yields NaN, matching PyTorch's empty mean.
    return -(total / count)


if __name__ == "__main__":
    key = jax.random.PRNGKey(0)
    k1, k2, k3, k4, k5, k6 = jax.random.split(key, 6)

    # 1) Lane-packed path (C=32 divides 128), single tile.
    N, C = 64, 32
    pred = jax.nn.log_softmax(jax.random.normal(k1, (N, C), jnp.float32), axis=-1)
    target = jax.random.randint(k2, (N,), 0, C, dtype=jnp.int32)
    loss = nll_loss(pred, target)
    jax.block_until_ready(loss)
    ref = -jnp.mean(pred[jnp.arange(N), target])
    assert jnp.allclose(loss, ref, atol=1e-5, rtol=1e-5), (loss, ref)

    # 2) Lane-packed path, multi-tile grid with a ragged last packed tile.
    N2, C2 = 1032, 32
    pred2 = jax.nn.log_softmax(jax.random.normal(k3, (N2, C2), jnp.float32), axis=-1)
    target2 = jax.random.randint(k4, (N2,), 0, C2, dtype=jnp.int32)
    loss2 = nll_loss(pred2, target2, tile_rows=64)
    jax.block_until_ready(loss2)
    ref2 = -jnp.mean(pred2[jnp.arange(N2), target2])
    assert jnp.allclose(loss2, ref2, atol=1e-5, rtol=1e-5), (loss2, ref2)

    # 3) Generic path (C does not divide 128), ragged rows + ignore_index=-100.
    N3, C3 = 20, 10
    pred3 = jax.nn.log_softmax(jax.random.normal(k5, (N3, C3), jnp.float32), axis=-1)
    target3 = jax.random.randint(k6, (N3,), 0, C3, dtype=jnp.int32)
    target3 = target3.at[3].set(-100)
    loss3 = nll_loss(pred3, target3, tile_rows=8)
    jax.block_until_ready(loss3)
    keep = target3 >= 0
    picked_ref = pred3[jnp.arange(N3), jnp.clip(target3, 0, C3 - 1)]
    ref3 = -(jnp.sum(jnp.where(keep, picked_ref, 0.0))
             / jnp.sum(keep.astype(jnp.float32)))
    assert jnp.allclose(loss3, ref3, atol=1e-5, rtol=1e-5), (loss3, ref3)

    print("KERNEL_OK")
</pallas_src>

<mosaic_0001>
module attributes {stable_mosaic.version = 11 : i64} {
  func.func @_nll_partial_kernel(%arg0: i32, %arg1: memref<16x128xf32, #tpu.memory_space<vmem>>, %arg2: memref<16x4xi32, #tpu.memory_space<vmem>>, %arg3: memref<1x1x2xf32, #tpu.memory_space<vmem>>) attributes {dimension_semantics = [#tpu.dimension_semantics<parallel>], iteration_bounds = array<i64: 1>, scalar_prefetch = 0 : i64, scratch_operands = 0 : i64, tpu.core_type = #tpu.core_type<tc>, window_params = [{transform_indices = @transform_0, window_bounds = array<i64: 16, 128>}, {transform_indices = @transform_1, window_bounds = array<i64: 16, 4>}, {transform_indices = @transform_2, window_bounds = array<i64: 1, 1, 2>}]} {
    %c0 = arith.constant 0 : index
    %c0_0 = arith.constant 0 : index
    %0 = vector.load %arg1[%c0, %c0_0] : memref<16x128xf32, #tpu.memory_space<vmem>>, vector<16x128xf32>
    %c0_1 = arith.constant 0 : index
    %c0_2 = arith.constant 0 : index
    %1 = vector.load %arg2[%c0_1, %c0_2] : memref<16x4xi32, #tpu.memory_space<vmem>>, vector<16x4xi32>
    %2 = tpu.iota {dimensions = array<i32: 0>} : vector<16x1xi32>
    %c16_i32 = arith.constant 16 : i32
    %3 = arith.muli %arg0, %c16_i32 : i32
    %4 = vector.broadcast %3 : i32 to vector<16x1xi32>
    %5 = arith.addi %2, %4 : vector<16x1xi32>
    %c16_i32_3 = arith.constant 16 : i32
    %6 = vector.broadcast %c16_i32_3 : i32 to vector<16x1xi32>
    %7 = arith.cmpi slt, %5, %6 : vector<16x1xi32>
    %8 = tpu.iota {dimensions = array<i32: 1>} : vector<16x128xi32>
    %9 = vector.extract_strided_slice %1 {offsets = [0, 0], sizes = [16, 1], strides = [1, 1]} : vector<16x4xi32> to vector<16x1xi32>
    %10 = vector.broadcast %9 : vector<16x1xi32> to vector<16x128xi32>
    %11 = arith.cmpi eq, %8, %10 : vector<16x128xi32>
    %12 = vector.extract_strided_slice %1 {offsets = [0, 1], sizes = [16, 1], strides = [1, 1]} : vector<16x4xi32> to vector<16x1xi32>
    %13 = vector.broadcast %12 : vector<16x1xi32> to vector<16x128xi32>
    %14 = arith.cmpi eq, %8, %13 : vector<16x128xi32>
    %15 = arith.ori %11, %14 : vector<16x128xi1>
    %16 = vector.extract_strided_slice %1 {offsets = [0, 2], sizes = [16, 1], strides = [1, 1]} : vector<16x4xi32> to vector<16x1xi32>
    %17 = vector.broadcast %16 : vector<16x1xi32> to vector<16x128xi32>
    %18 = arith.cmpi eq, %8, %17 : vector<16x128xi32>
    %19 = arith.ori %15, %18 : vector<16x128xi1>
    %20 = vector.extract_strided_slice %1 {offsets = [0, 3], sizes = [16, 1], strides = [1, 1]} : vector<16x4xi32> to vector<16x1xi32>
    %21 = vector.broadcast %20 : vector<16x1xi32> to vector<16x128xi32>
    %22 = arith.cmpi eq, %8, %21 : vector<16x128xi32>
    %23 = arith.ori %19, %22 : vector<16x128xi1>
    %24 = vector.broadcast %7 : vector<16x1xi1> to vector<16x128xi1>
    %25 = arith.andi %23, %24 : vector<16x128xi1>
    %cst = arith.constant 0.000000e+00 : f32
    %26 = vector.broadcast %cst : f32 to vector<16x128xf32>
    %27 = arith.select %25, %0, %26 : vector<16x128xi1>, vector<16x128xf32>
    %28 = vector.shape_cast %27 : vector<16x128xf32> to vector<1x16x128xf32>
    %cst_4 = arith.constant dense<0.000000e+00> : vector<1xf32>
    %29 = vector.multi_reduction <add>, %28, %cst_4 [1, 2] : vector<1x16x128xf32> to vector<1xf32>
    %30 = vector.shape_cast %29 : vector<1xf32> to vector<1x1x1xf32>
    %31 = vector.extract %30[0, 0, 0] : f32 from vector<1x1x1xf32>
    %32 = arith.extui %25 : vector<16x128xi1> to vector<16x128xi32>
    %33 = arith.sitofp %32 : vector<16x128xi32> to vector<16x128xf32>
    %34 = vector.shape_cast %33 : vector<16x128xf32> to vector<1x16x128xf32>
    %cst_5 = arith.constant dense<0.000000e+00> : vector<1xf32>
    %35 = vector.multi_reduction <add>, %34, %cst_5 [1, 2] : vector<1x16x128xf32> to vector<1xf32>
    %36 = vector.shape_cast %35 : vector<1xf32> to vector<1x1x1xf32>
    %37 = vector.extract %36[0, 0, 0] : f32 from vector<1x1x1xf32>
    %38 = tpu.iota {dimensions = array<i32: 2>} : vector<1x1x2xi32>
    %c0_i32 = arith.constant 0 : i32
    %39 = vector.broadcast %c0_i32 : i32 to vector<1x1x2xi32>
    %40 = arith.cmpi eq, %38, %39 : vector<1x1x2xi32>
    %41 = vector.broadcast %31 : f32 to vector<1x1x2xf32>
    %42 = vector.broadcast %37 : f32 to vector<1x1x2xf32>
    %43 = arith.select %40, %41, %42 : vector<1x1x2xi1>, vector<1x1x2xf32>
    %c0_6 = arith.constant 0 : index
    %c0_7 = arith.constant 0 : index
    %c0_8 = arith.constant 0 : index
    %44 = vector.load %arg3[%c0_6, %c0_7, %c0_8] : memref<1x1x2xf32, #tpu.memory_space<vmem>>, vector<1x1x2xf32>
    tpu.vector_store %arg3[%c0_6, %c0_7, %c0_8], %43 {strides = array<i32>} : memref<1x1x2xf32, #tpu.memory_space<vmem>>, vector<1x1x2xf32>,
    return
  }
  func.func @transform_0(%arg0: i32) -> (i32, i32) {
    %c0_i32 = arith.constant 0 : i32
    %c0_i32_0 = arith.constant 0 : i32
    return %arg0, %c0_i32 : i32, i32
  }
  func.func @transform_1(%arg0: i32) -> (i32, i32) {
    %c0_i32 = arith.constant 0 : i32
    %c0_i32_0 = arith.constant 0 : i32
    return %arg0, %c0_i32 : i32, i32
  }
  func.func @transform_2(%arg0: i32) -> (i32, i32, i32) {
    %c0_i32 = arith.constant 0 : i32
    %c0_i32_0 = arith.constant 0 : i32
    %c0_i32_1 = arith.constant 0 : i32
    return %arg0, %c0_i32, %c0_i32_0 : i32, i32, i32
  }
}

</mosaic_0001>

<bundles_post_ra>
// kernel: tpu_custom_call.1
= control target key start
LH: loop header
LB: loop body
LE: loop exit
PB: predicated region body
PF: predicated region fallthrough
CT: control target
= control target key end

     0   :  { %v157_v1 = vmov 1   ;;  %v158_v2 = vmov 0   ;;  %s193_s0 = inlined_call_operand.vmem [shape: f32[16,128], index: 0, kind: input, shape index: {}]   ;;  %s194_s1 = inlined_call_operand.vmem [shape: s32[16,4], index: 1, kind: input, shape index: {}]   ;;  %s195_s2 = inlined_call_operand.hbm [shape: f32[1,1,2], index: 2, kind: output, shape index: {}]  }
   0x1   :  { %v14_v0 = vld [vmem:[%s194_s1] sm:$0xff]  ;;  %130 = vset.pattern.permute.xlu1 %v157_v1  ;;  %129 = vset.pattern.permute.xlu0 %v158_v2 }
   0x2   :  { %7 = vsyncpa [#allocation3], 0  ;;  %36 = vperm.xlu1 %130, %v14_v0   ;;  %28 = vperm.xlu0 %129, %v14_v0   ;;  %v15_v3 = vld [vmem:[%s194_s1 + $0x8] sm:$0xff]  ;;  %v159_v4 = vmov 2   ;;  %v160_v5 = vmov 3   ;;  %v25_v8 = vlaneseq  ;;  %v12_v16 = vld [vmem:[%s193_s0] sm:$0xff] }
   0x3   :  { %v13_v17 = vld [vmem:[%s193_s0 + $0x8] sm:$0xff]  ;;  %v161_v18 = vmov 0.0   ;;  %s162_s0 = smov [#allocation2]   ;;  %vm101_vm15 = vcmask 8192  }
   0x4   :  { %v26_v11 = vand.u32 127, %v25_v8  ;;  %s109_s16 = sshll.u32 %s162_s0, 4  ;;  %s110_s16 = int_to_ptr.vmem [resolvable:$true] %s109_s16 }
   0x5   :  { %s135_s19 = scalar_lea.vmem %s110_s16, 16  ;;  %s139_s20 = scalar_lea.vmem %s110_s16, 32 }
   0x6   :  { %39 = vperm.xlu1 %130, %v15_v3   ;;  %31 = vperm.xlu0 %129, %v15_v3   ;;  %vm97_vm14 = vcmp.eq.s32.totalorder %v26_v11, 0  ;;  %p136_p0 = scmp.ne.s32.totalorder %s110_s16, %s135_s19  ;;  %p140_p1 = scmp.lt.s32.totalorder %s110_s16, %s110_s16 }
   0x7   :  { %p141_p2 = scmp.lt.s32.totalorder %s139_s20, %s135_s19 }
   0x9   :  { %p142_p3 = por %p141_p2, %p140_p1 }
   0xa   :  { %132 = vset.pattern.permute.xlu1 %v159_v4  ;;  %131 = vset.pattern.permute.xlu0 %v159_v4 }
   0xb   :  { %49 = vperm.xlu1 %132, %v15_v3   ;;  %46 = vperm.xlu0 %131, %v14_v0   ;;  %p143_p4 = pnand %p142_p3, %p136_p0 }
   0xf   :  { %133 = vset.pattern.permute.xlu1 %v160_v5  ;;  %134 = vset.pattern.permute.xlu0 %v160_v5 }
  0x10   :  { %56 = vperm.xlu1 %133, %v14_v0   ;;  %59 = vperm.xlu0 %134, %v15_v3  }
  0x7d   :  { %v37_v6 = vpop.permute.xlu1 %36  ;;  %v29_v7 = vpop.permute.xlu0 %28 }
  0x7e   :  { %vm41_vm0 = vcmp.eq.s32.totalorder %v26_v11, %v37_v6  ;;  %vm33_vm1 = vcmp.eq.s32.totalorder %v26_v11, %v29_v7 }
  0x7f   :  { %vm43_vm5 = vmor %vm33_vm1, %vm41_vm0 }
  0x81   :  { %v40_v9 = vpop.permute.xlu1 %39  ;;  %v32_v10 = vpop.permute.xlu0 %31 }
  0x82   :  { %vm42_vm2 = vcmp.eq.s32.totalorder %v26_v11, %v40_v9  ;;  %vm34_vm3 = vcmp.eq.s32.totalorder %v26_v11, %v32_v10 }
  0x83   :  { %vm44_vm7 = vmor %vm34_vm3, %vm42_vm2 }
  0x86   :  { %v50_v12 = vpop.permute.xlu1 %49  ;;  %v47_v13 = vpop.permute.xlu0 %46 }
  0x87   :  { %vm52_vm4 = vcmp.eq.s32.totalorder %v26_v11, %v50_v12  ;;  %vm51_vm6 = vcmp.eq.s32.totalorder %v26_v11, %v47_v13 }
  0x88   :  { %vm54_vm8 = vmor %vm44_vm7, %vm52_vm4 }
  0x89   :  { %vm53_vm9 = vmor %vm43_vm5, %vm51_vm6 }
  0x8b   :  { %v57_v14 = vpop.permute.xlu1 %56  ;;  %v60_v15 = vpop.permute.xlu0 %59 }
  0x8c   :  { %vm61_vm10 = vcmp.eq.s32.totalorder %v26_v11, %v57_v14  ;;  %vm62_vm11 = vcmp.eq.s32.totalorder %v26_v11, %v60_v15 }
  0x8d   :  { %vm63_vm12 = vmor %vm53_vm9, %vm61_vm10 }
  0x8e   :  { %vm64_vm13 = vmor %vm54_vm8, %vm62_vm11  ;;  %v117_v19 = vsel %vm63_vm12, 1.0, %v161_v18  ;;  %v71_v20 = vsel %vm63_vm12, %v12_v16, 0.0 }
  0x8f   :  { %v118_v21 = vsel %vm64_vm13, 1.0, %v161_v18  ;;  %v72_v22 = vsel %vm64_vm13, %v13_v17, 0.0 }
  0x90   :  { %v87_v23 = vadd.f32 %v118_v21, %v117_v19  ;;  %v73_v24 = vadd.f32 %v72_v22, %v71_v20 }
  0x92   :  { %88 = vadd.xlane.f32.xlu0 %v87_v23  ;;  %74 = vadd.xlane.f32.xlu1 %v73_v24 }
 0x11b   :  { %v89_v25 = vpop.xlane.xlu0 %88  ;;  %v75_v26 = vpop.xlane.xlu1 %74 }
 0x11c   :  { %v90_v27 = vrot.slane %v89_v25, 4  ;;  %v76_v28 = vrot.slane %v75_v26, 4 }
 0x11e   :  { %v91_v29 = vadd.f32 %v90_v27, %v89_v25  ;;  %v77_v30 = vadd.f32 %v76_v28, %v75_v26 }
 0x120   :  { %v92_v31 = vrot.slane %v91_v29, 2  ;;  %v78_v32 = vrot.slane %v77_v30, 2 }
 0x122   :  { %v93_v33 = vadd.f32 %v92_v31, %v91_v29  ;;  %v79_v34 = vadd.f32 %v78_v32, %v77_v30 }
 0x124   :  { %v80_v35 = vrot.slane %v79_v34, 1  ;;  %v94_v36 = vrot.slane %v93_v33, 1 }
 0x126   :  { %v81_v37 = vadd.f32 %v80_v35, %v79_v34  ;;  %v95_v38 = vadd.f32 %v94_v36, %v93_v33 }
 0x128   :  { %119 = vpush %v81_v37 }
 0x129   :  { %121 = vpush %v95_v38 }
 0x159   :  { %s120_s17 = spop %119 }
 0x15a   :  { %v98_v39 = vstv %s120_s17  ;;  %s122_s18 = spop %121 }
 0x15b   :  { %v99_v40 = vstv %s122_s18 }
 0x15c   :  { %v100_v41 = vsel %vm97_vm14, %v98_v39, %v99_v40 }
 0x15d   :  { %102 = vst.msk [vmem:[#allocation2] sm:$0x1] %vm101_vm15, %v100_v41 }
 0x15e   :  { %146 = shalt.err (!%p143_p4)
}
 0x15f   :  { %112 = dma.vmem_to_hbm [thread:$0]  %s110_s16, 16, %s195_s2, [#allocation3]  }
 0x160   :  { %155 = dma.done.wait [#allocation3], 16  }
 0x161   :  { %156 = vsyncadd [#allocation3], 4294967280 }
 0x162   :  { %116 = vsyncpa [#allocation3], 1 }

</bundles_post_ra>
